<compile_context>
chip_gen: v5e
topology: v5e:2x2
jax: 0.10.0
libtpu: 0.0.40
codegen_flags: <defaults>
</compile_context>

<pallas_src>
import functools

import jax
import jax.numpy as jnp
from jax.experimental import pallas as pl
from jax.experimental.pallas import tpu as pltpu


def _round_up(x, m):
    return ((x + m - 1) // m) * m


def _mlp_kernel(x_ref, w1_ref, b1_ref, w2_ref, b2_ref, w3_ref, b3_ref, o_ref):
    # One batch tile per grid step; the whole 3-layer forward runs in VMEM.
    # Matmuls are bf16 on the MXU with f32 accumulation; bias-add/ReLU on the
    # VPU in f32 (free in the VALU slack — the kernel is HBM-bandwidth bound).
    x = x_ref[...]                                                     # (TB, 64) bf16
    h1 = jnp.dot(x, w1_ref[...], preferred_element_type=jnp.float32) + b1_ref[...]
    h1 = jnp.maximum(h1, 0.0).astype(w2_ref.dtype)                     # (TB, 32) bf16
    h2 = jnp.dot(h1, w2_ref[...], preferred_element_type=jnp.float32) + b2_ref[...]
    h2 = jnp.maximum(h2, 0.0).astype(w3_ref.dtype)                     # (TB, 16) bf16
    h3 = jnp.dot(h2, w3_ref[...], preferred_element_type=jnp.float32) + b3_ref[...]
    o_ref[...] = h3.astype(o_ref.dtype)                                # (TB, 128) f32


@functools.partial(jax.jit, static_argnames=("tile_b",))
def mymlp_forward(x, params, *, tile_b=4096):
    """Forward pass of MyMLP.

    x: any shape (B, ...) whose trailing dims flatten to in_features (64).
    params: dict with w1 (in,32), b1 (1,32), w2 (32,16), b2 (1,16),
            w3 (16,out), b3 (1,out)  (float32).
    Returns (B, out_features) float32.
    """
    B = x.shape[0]
    x2d = x.reshape(B, -1)                          # glue: torch's x.view(B, -1)
    in_features = x2d.shape[1]
    out_features = params["w3"].shape[1]

    # bf16 activations + weights (halves HBM traffic for x); biases stay f32.
    x2d = x2d.astype(jnp.bfloat16)
    w1 = params["w1"].astype(jnp.bfloat16)
    w2 = params["w2"].astype(jnp.bfloat16)
    w3 = params["w3"].astype(jnp.bfloat16)
    b1 = params["b1"].astype(jnp.float32)
    b2 = params["b2"].astype(jnp.float32)
    b3 = params["b3"].astype(jnp.float32)

    # Lane-dense output: pad the final projection to a multiple of 128 lanes.
    out_pad = max(128, _round_up(out_features, 128))
    if out_pad != out_features:
        w3 = jnp.pad(w3, ((0, 0), (0, out_pad - out_features)))
        b3 = jnp.pad(b3, ((0, 0), (0, out_pad - out_features)))

    # Batch tile: big enough to amortize per-step overhead, never larger than
    # the (8-aligned) batch itself.  Pad B so there is no ragged last tile.
    tb = min(tile_b, _round_up(B, 8))
    b_pad = _round_up(B, tb)
    if b_pad != B:
        x2d = jnp.pad(x2d, ((0, b_pad - B), (0, 0)))
    grid = (b_pad // tb,)

    # Advisory cost estimate for the XLA scheduler around the custom call.
    flops = 2 * b_pad * (in_features * 32 + 32 * 16 + 16 * out_pad)
    weight_bytes = sum(int(a.size) * a.dtype.itemsize for a in (w1, b1, w2, b2, w3, b3))
    bytes_accessed = b_pad * (in_features * 2 + out_pad * 4) + weight_bytes

    out = pl.pallas_call(
        _mlp_kernel,
        out_shape=jax.ShapeDtypeStruct((b_pad, out_pad), jnp.float32),
        grid=grid,
        in_specs=[
            pl.BlockSpec((tb, in_features), lambda i: (i, 0)),   # x: tiled over batch
            pl.BlockSpec(w1.shape, lambda i: (0, 0)),            # weights/biases:
            pl.BlockSpec(b1.shape, lambda i: (0, 0)),            # constant block index
            pl.BlockSpec(w2.shape, lambda i: (0, 0)),            # -> VMEM-resident,
            pl.BlockSpec(b2.shape, lambda i: (0, 0)),            #    no re-DMA per step
            pl.BlockSpec(w3.shape, lambda i: (0, 0)),
            pl.BlockSpec(b3.shape, lambda i: (0, 0)),
        ],
        out_specs=pl.BlockSpec((tb, out_pad), lambda i: (i, 0)),
        compiler_params=pltpu.CompilerParams(
            dimension_semantics=("parallel",),
        ),
        cost_estimate=pl.CostEstimate(
            flops=flops, transcendentals=0, bytes_accessed=bytes_accessed),
    )(x2d, w1, b1, w2, b2, w3, b3)

    return out[:B, :out_features]


def init_params(key, in_features=64, out_features=10):
    """Deterministic synthetic parameters matching nn.Linear shapes.

    torch Linear(in, out) has weight (out, in), bias (out,).
    We store weight transposed -> (in, out), bias -> (1, out).
    """
    dims = [(in_features, 32), (32, 16), (16, out_features)]
    params = {}
    for i, (din, dout) in enumerate(dims, start=1):
        key, kw, kb = jax.random.split(key, 3)
        bound = 1.0 / (din ** 0.5)  # same scale as torch's default Linear init
        params[f"w{i}"] = jax.random.uniform(
            kw, (din, dout), jnp.float32, minval=-bound, maxval=bound)
        params[f"b{i}"] = jax.random.uniform(
            kb, (1, dout), jnp.float32, minval=-bound, maxval=bound)
    return params


def _ref_forward(x, params):
    """Pure-JAX reference replicating the kernel's bf16 casts."""
    def bf(a):
        return a.astype(jnp.bfloat16).astype(jnp.float32)
    x2d = bf(x.reshape(x.shape[0], -1))
    h1 = jnp.maximum(x2d @ bf(params["w1"]) + params["b1"], 0.0)
    h2 = jnp.maximum(bf(h1) @ bf(params["w2"]) + params["b2"], 0.0)
    return bf(h2) @ bf(params["w3"]) + params["b3"]


if __name__ == "__main__":
    key = jax.random.PRNGKey(0)
    kp, kx, kx2 = jax.random.split(key, 3)

    params = init_params(kp, in_features=64, out_features=10)

    # Small input consistent with the module: batch=2, flattens to 4*4*4 = 64.
    x = jax.random.normal(kx, (2, 4, 4, 4), dtype=jnp.float32)
    out = jax.block_until_ready(mymlp_forward(x, params))
    ref = _ref_forward(x, params)
    assert out.shape == (2, 10)
    assert jnp.allclose(out, ref, atol=1e-3, rtol=1e-3)

    # Exercise the batch grid + padding path (B=100 with a 32-row tile -> 4 tiles).
    xb = jax.random.normal(kx2, (100, 64), dtype=jnp.float32)
    outb = jax.block_until_ready(mymlp_forward(xb, params, tile_b=32))
    refb = _ref_forward(xb, params)
    assert outb.shape == (100, 10)
    assert jnp.allclose(outb, refb, atol=1e-3, rtol=1e-3)

    print("KERNEL_OK")
</pallas_src>

<mosaic_0001>
module attributes {stable_mosaic.version = 11 : i64} {
  func.func @_mlp_kernel(%arg0: i32, %arg1: memref<8x64xbf16, #tpu.memory_space<vmem>>, %arg2: memref<64x32xbf16, #tpu.memory_space<vmem>>, %arg3: memref<1x32xf32, #tpu.memory_space<vmem>>, %arg4: memref<32x16xbf16, #tpu.memory_space<vmem>>, %arg5: memref<1x16xf32, #tpu.memory_space<vmem>>, %arg6: memref<16x128xbf16, #tpu.memory_space<vmem>>, %arg7: memref<1x128xf32, #tpu.memory_space<vmem>>, %arg8: memref<8x128xf32, #tpu.memory_space<vmem>>) attributes {dimension_semantics = [#tpu.dimension_semantics<parallel>], iteration_bounds = array<i64: 1>, scalar_prefetch = 0 : i64, scratch_operands = 0 : i64, tpu.core_type = #tpu.core_type<tc>, window_params = [{transform_indices = @transform_0, window_bounds = array<i64: 8, 64>}, {pipeline_mode = #tpu.pipeline_mode<synchronous>, transform_indices = @transform_1, window_bounds = array<i64: 64, 32>}, {pipeline_mode = #tpu.pipeline_mode<synchronous>, transform_indices = @transform_2, window_bounds = array<i64: 1, 32>}, {pipeline_mode = #tpu.pipeline_mode<synchronous>, transform_indices = @transform_3, window_bounds = array<i64: 32, 16>}, {pipeline_mode = #tpu.pipeline_mode<synchronous>, transform_indices = @transform_4, window_bounds = array<i64: 1, 16>}, {pipeline_mode = #tpu.pipeline_mode<synchronous>, transform_indices = @transform_5, window_bounds = array<i64: 16, 128>}, {pipeline_mode = #tpu.pipeline_mode<synchronous>, transform_indices = @transform_6, window_bounds = array<i64: 1, 128>}, {transform_indices = @transform_7, window_bounds = array<i64: 8, 128>}]} {
    %c0 = arith.constant 0 : index
    %c0_0 = arith.constant 0 : index
    %0 = vector.load %arg1[%c0, %c0_0] : memref<8x64xbf16, #tpu.memory_space<vmem>>, vector<8x64xbf16>
    %c0_1 = arith.constant 0 : index
    %c0_2 = arith.constant 0 : index
    %1 = vector.load %arg2[%c0_1, %c0_2] : memref<64x32xbf16, #tpu.memory_space<vmem>>, vector<64x32xbf16>
    %cst = arith.constant dense<0.000000e+00> : vector<8x32xf32>
    %2 = tpu.matmul %0, %1, %cst {dimension_numbers = #tpu.dot_dimension_numbers<[1], [0], [0], [1], [0, 0, 1, 1], [], []>} : vector<8x64xbf16>, vector<64x32xbf16>, vector<8x32xf32> -> vector<8x32xf32>
    %c0_3 = arith.constant 0 : index
    %c0_4 = arith.constant 0 : index
    %3 = vector.load %arg3[%c0_3, %c0_4] : memref<1x32xf32, #tpu.memory_space<vmem>>, vector<1x32xf32>
    %4 = vector.broadcast %3 : vector<1x32xf32> to vector<8x32xf32>
    %5 = arith.addf %2, %4 : vector<8x32xf32>
    %cst_5 = arith.constant 0.000000e+00 : f32
    %6 = vector.broadcast %cst_5 : f32 to vector<8x32xf32>
    %7 = arith.maximumf %5, %6 : vector<8x32xf32>
    %8 = arith.truncf %7 : vector<8x32xf32> to vector<8x32xbf16>
    %c0_6 = arith.constant 0 : index
    %c0_7 = arith.constant 0 : index
    %9 = vector.load %arg4[%c0_6, %c0_7] : memref<32x16xbf16, #tpu.memory_space<vmem>>, vector<32x16xbf16>
    %cst_8 = arith.constant dense<0.000000e+00> : vector<8x16xf32>
    %10 = tpu.matmul %8, %9, %cst_8 {dimension_numbers = #tpu.dot_dimension_numbers<[1], [0], [0], [1], [0, 0, 1, 1], [], []>} : vector<8x32xbf16>, vector<32x16xbf16>, vector<8x16xf32> -> vector<8x16xf32>
    %c0_9 = arith.constant 0 : index
    %c0_10 = arith.constant 0 : index
    %11 = vector.load %arg5[%c0_9, %c0_10] : memref<1x16xf32, #tpu.memory_space<vmem>>, vector<1x16xf32>
    %12 = vector.broadcast %11 : vector<1x16xf32> to vector<8x16xf32>
    %13 = arith.addf %10, %12 : vector<8x16xf32>
    %cst_11 = arith.constant 0.000000e+00 : f32
    %14 = vector.broadcast %cst_11 : f32 to vector<8x16xf32>
    %15 = arith.maximumf %13, %14 : vector<8x16xf32>
    %16 = arith.truncf %15 : vector<8x16xf32> to vector<8x16xbf16>
    %c0_12 = arith.constant 0 : index
    %c0_13 = arith.constant 0 : index
    %17 = vector.load %arg6[%c0_12, %c0_13] : memref<16x128xbf16, #tpu.memory_space<vmem>>, vector<16x128xbf16>
    %cst_14 = arith.constant dense<0.000000e+00> : vector<8x128xf32>
    %18 = tpu.matmul %16, %17, %cst_14 {dimension_numbers = #tpu.dot_dimension_numbers<[1], [0], [0], [1], [0, 0, 1, 1], [], []>} : vector<8x16xbf16>, vector<16x128xbf16>, vector<8x128xf32> -> vector<8x128xf32>
    %c0_15 = arith.constant 0 : index
    %c0_16 = arith.constant 0 : index
    %19 = vector.load %arg7[%c0_15, %c0_16] : memref<1x128xf32, #tpu.memory_space<vmem>>, vector<1x128xf32>
    %20 = vector.broadcast %19 : vector<1x128xf32> to vector<8x128xf32>
    %21 = arith.addf %18, %20 : vector<8x128xf32>
    %c0_17 = arith.constant 0 : index
    %c0_18 = arith.constant 0 : index
    %22 = vector.load %arg8[%c0_17, %c0_18] : memref<8x128xf32, #tpu.memory_space<vmem>>, vector<8x128xf32>
    tpu.vector_store %arg8[%c0_17, %c0_18], %21 {strides = array<i32>} : memref<8x128xf32, #tpu.memory_space<vmem>>, vector<8x128xf32>,
    return
  }
  func.func @transform_0(%arg0: i32) -> (i32, i32) {
    %c0_i32 = arith.constant 0 : i32
    %c0_i32_0 = arith.constant 0 : i32
    return %arg0, %c0_i32 : i32, i32
  }
  func.func @transform_1(%arg0: i32) -> (i32, i32) {
    %c0_i32 = arith.constant 0 : i32
    %c0_i32_0 = arith.constant 0 : i32
    %c0_i32_1 = arith.constant 0 : i32
    return %c0_i32, %c0_i32_0 : i32, i32
  }
  func.func @transform_2(%arg0: i32) -> (i32, i32) {
    %c0_i32 = arith.constant 0 : i32
    %c0_i32_0 = arith.constant 0 : i32
    %c0_i32_1 = arith.constant 0 : i32
    return %c0_i32, %c0_i32_0 : i32, i32
  }
  func.func @transform_3(%arg0: i32) -> (i32, i32) {
    %c0_i32 = arith.constant 0 : i32
    %c0_i32_0 = arith.constant 0 : i32
    %c0_i32_1 = arith.constant 0 : i32
    return %c0_i32, %c0_i32_0 : i32, i32
  }
  func.func @transform_4(%arg0: i32) -> (i32, i32) {
    %c0_i32 = arith.constant 0 : i32
    %c0_i32_0 = arith.constant 0 : i32
    %c0_i32_1 = arith.constant 0 : i32
    return %c0_i32, %c0_i32_0 : i32, i32
  }
  func.func @transform_5(%arg0: i32) -> (i32, i32) {
    %c0_i32 = arith.constant 0 : i32
    %c0_i32_0 = arith.constant 0 : i32
    %c0_i32_1 = arith.constant 0 : i32
    return %c0_i32, %c0_i32_0 : i32, i32
  }
  func.func @transform_6(%arg0: i32) -> (i32, i32) {
    %c0_i32 = arith.constant 0 : i32
    %c0_i32_0 = arith.constant 0 : i32
    %c0_i32_1 = arith.constant 0 : i32
    return %c0_i32, %c0_i32_0 : i32, i32
  }
  func.func @transform_7(%arg0: i32) -> (i32, i32) {
    %c0_i32 = arith.constant 0 : i32
    %c0_i32_0 = arith.constant 0 : i32
    return %arg0, %c0_i32 : i32, i32
  }
}

</mosaic_0001>

<bundles_post_ra>
// kernel: mymlp_forward.1
= control target key start
LH: loop header
LB: loop body
LE: loop exit
PB: predicated region body
PF: predicated region fallthrough
CT: control target
= control target key end

     0   :  { %vm64_vm0 = vcmask 523264   ;;  %vm103_vm1 = vcmask 261120   ;;  %vm134_vm2 = vcmask 130048   ;;  %s273_s1 = inlined_call_operand.vmem [shape: bf16[64,32], index: 1, kind: input, shape index: {}]   ;;  %s274_s2 = inlined_call_operand.vmem [shape: f32[1,32], index: 2, kind: input, shape index: {}]   ;;  %s275_s0 = inlined_call_operand.vmem [shape: bf16[8,64], index: 0, kind: input, shape index: {}]   ;;  %s276_s4 = inlined_call_operand.vmem [shape: f32[1,16], index: 4, kind: input, shape index: {}]   ;;  %s277_s3 = inlined_call_operand.vmem [shape: bf16[32,16], index: 3, kind: input, shape index: {}]   ;;  %s278_s6 = inlined_call_operand.vmem [shape: f32[1,128], index: 6, kind: input, shape index: {}]   ;;  %s279_s5 = inlined_call_operand.vmem [shape: bf16[16,128], index: 5, kind: input, shape index: {}]   ;;  %s280_s7 = inlined_call_operand.vmem [shape: f32[8,128], index: 7, kind: output, shape index: {}]  }
   0x1   :  { %v190_v0 = vld [vmem:[%s273_s1 + $0x18] sm:$0xff]  ;;  %v189_v1 = vld [vmem:[%s273_s1 + $0x10] sm:$0xff]  ;;  %v188_v2 = vld [vmem:[%s273_s1 + $0x8] sm:$0xff] }
   0x2   :  { %72 = vmatpush.bf16.msra.mxu0 %v190_v0  ;;  %v187_v3 = vld [vmem:[%s273_s1] sm:$0xff]  ;;  %v192_v5 = vld [vmem:[%s277_s3 + $0x8] sm:$0xff] }
   0x3   :  { %v27_v4 = vld [vmem:[%s275_s0] sm:$0xf]  ;;  %113 = vmatpush.bf16.msra.mxu1 %v192_v5 }
   0x4   :  { %v191_v6 = vld [vmem:[%s277_s3] sm:$0xff] }
   0x5   :  { %v194_v7 = vld [vmem:[%s274_s2] ss:$0 sm:$0xff] }
   0x6   :  { %73 = vmatpush.bf16.msra.mxu0 %v189_v1  ;;  %v193_v13 = vld [vmem:[%s279_s5] sm:$0xff] }
   0x7   :  { %114 = vmatpush.bf16.msra.mxu1 %v191_v6  ;;  %145 = vmatpush.bf16.msra.mxu2 %v193_v13  ;;  %v195_v14 = vld [vmem:[%s276_s4] ss:$0 sm:$0xff] }
   0x8   :  { %v196_v20 = vld [vmem:[%s278_s6] ss:$0 sm:$0xff] }
   0xa   :  { %74 = vmatpush.bf16.msra.mxu0 %v188_v2 }
   0xe   :  { %75 = vmatpush.bf16.msra.mxu0 %v187_v3 }
  0x11   :  { %172 = vmatmul.msk.bf16.vlgmr.msra.gmra.mxu0 %vm64_vm0, %v27_v4 }
  0x8e   :  { %v77_v8 = vpop.f32.mrf.mxu0 }
  0x8f   :  { %v78_v9 = vadd.f32 %v194_v7, %v77_v8 }
  0x91   :  { %v81_v10 = vmax.f32 %v78_v9, 0.0 }
  0x93   :  { %v82_v11 = vpack.c.bf16 %v81_v10, %v81_v10 }
  0x95   :  { %181 = vmatmul.msk.bf16.vlgmr.msra.gmra.mxu1 %vm103_vm1, %v82_v11 }
  0x96   :  { %v79_v12 = vpop.f32.mrf.mxu0 }
 0x112   :  { %v116_v15 = vpop.f32.mrf.mxu1 }
 0x113   :  { %v117_v16 = vadd.f32 %v195_v14, %v116_v15 }
 0x115   :  { %v120_v17 = vmax.f32 %v117_v16, 0.0 }
 0x117   :  { %v121_v18 = vpack.c.bf16 %v120_v17, %v120_v17 }
 0x119   :  { %186 = vmatmul.msk.bf16.vlgmr.msra.gmra.mxu2 %vm134_vm2, %v121_v18 }
 0x11a   :  { %v118_v19 = vpop.f32.mrf.mxu1 }
 0x19c   :  { %v147_v21 = vpop.f32.mrf.mxu2 }
 0x19d   :  { %v148_v22 = vadd.f32 %v196_v20, %v147_v21 }
 0x19f   :  { %151 = vst [vmem:[%s280_s7] sm:$0xff] %v148_v22 }
 0x1a4   :  { %v149_v23 = vpop.f32.mrf.mxu2 }

</bundles_post_ra>
